<compile_context>
chip_gen: v5e
topology: v5e:2x2
jax: 0.10.0
libtpu: 0.0.40
codegen_flags: <defaults>
</compile_context>

<pallas_src>
import functools
import math

import jax
import jax.numpy as jnp
from jax import lax
from jax.experimental import pallas as pl
from jax.experimental.pallas import tpu as pltpu


def _residual_block_kernel(x_ref, w1_ref, w2_ref, o_ref, *, H, W):
    # x_ref : (N*C, H*W)   batch folded into sublanes, lane-dense flat spatial
    # w*_ref: (N*C, 9*N*C) block-diagonal im2col weight (bias dropped — cancels
    #                      exactly in the non-affine InstanceNorm that follows)
    # o_ref : (N*C, H*W)
    NC, HW = x_ref.shape

    x = x_ref[...].astype(jnp.float32)
    w1 = w1_ref[...].astype(jnp.float32)
    w2 = w2_ref[...].astype(jnp.float32)

    # Flat-lane-position masks for the reflected borders (computed once).
    p = lax.broadcasted_iota(jnp.int32, (NC, HW), 1)
    col = p % W
    mask_w0 = col == 0                 # w == 0
    mask_wl = col == W - 1             # w == W-1
    mask_h0 = p < W                    # h == 0
    mask_hl = p >= (H - 1) * W         # h == H-1

    def refl_taps(a):
        # 9 reflection-padded 3x3 taps of `a` (each (NC, HW)), built with
        # lane-axis rolls (XLU slot) + masked border fixups, in (dh, dw)
        # raster order matching the weight-matrix column order.
        up = pltpu.roll(a, shift=HW - W, axis=1)   # up[p] = a[p+W] -> a(h+1, w)
        dn = pltpu.roll(a, shift=W, axis=1)        # dn[p] = a[p-W] -> a(h-1, w)
        v_m1 = jnp.where(mask_h0, up, dn)          # reflected row above
        v_p1 = jnp.where(mask_hl, dn, up)          # reflected row below
        taps = []
        for v in (v_m1, a, v_p1):
            r = pltpu.roll(v, shift=HW - 1, axis=1)   # r[p] = v[p+1] -> v(h, w+1)
            l = pltpu.roll(v, shift=1, axis=1)        # l[p] = v[p-1] -> v(h, w-1)
            t_m1 = jnp.where(mask_w0, r, l)           # reflected left column
            t_p1 = jnp.where(mask_wl, l, r)           # reflected right column
            taps.extend((t_m1, v, t_p1))
        return taps

    def conv3x3(a, w_big):
        # Single MXU contraction for the whole batch: (NC, 9*NC) @ (9*NC, HW).
        stk = jnp.concatenate(refl_taps(a), axis=0)   # (9*NC, HW), 8-aligned rows
        return jnp.dot(w_big, stk, preferred_element_type=jnp.float32)

    def instance_norm(a, eps=1e-5):
        # Per-(n, c) row stats over the lane axis (H*W); biased variance.
        mean = jnp.mean(a, axis=1, keepdims=True)
        cen = a - mean
        var = jnp.mean(cen * cen, axis=1, keepdims=True)
        return cen * lax.rsqrt(var + eps)

    y = conv3x3(x, w1)
    y = jnp.maximum(instance_norm(y), 0.0)
    y = conv3x3(y, w2)
    y = instance_norm(y)

    o_ref[...] = (x + y).astype(o_ref.dtype)


@jax.jit
def residual_block(x_nchw, w1, b1, w2, b2):
    """x_nchw: (N, C, H, W) like PyTorch. Weights HWIO (3,3,C,C), biases (C,).

    Biases are accepted for interface parity with nn.Conv2d but are an exact
    no-op here (non-affine InstanceNorm follows each conv), so they are not
    passed to the kernel.
    """
    del b1, b2  # cancel exactly in the following InstanceNorm2d
    N, C, H, W = x_nchw.shape
    NC, HW = N * C, H * W

    # Contiguous reshape only — no HBM transpose.
    xf = x_nchw.reshape(NC, HW)

    def to_big(w):
        # Block-diagonal im2col weight:
        #   row = n*C + cout, col = tap*(N*C) + n*C + cin, tap = dh*3 + dw.
        eye = jnp.eye(N, dtype=jnp.float32)
        blocks = [jnp.kron(eye, w[dh, dw].astype(jnp.float32).T)  # (Cout,Cin)
                  for dh in range(3) for dw in range(3)]
        return jnp.concatenate(blocks, axis=1)                    # (NC, 9*NC)

    w1m = to_big(w1)
    w2m = to_big(w2)

    flops = 2 * (2 * NC * (9 * NC) * HW)          # two im2col matmuls
    bytes_accessed = 4 * (2 * NC * HW + 2 * NC * 9 * NC)
    transcendentals = 2 * NC                      # rsqrt per row per norm

    out = pl.pallas_call(
        functools.partial(_residual_block_kernel, H=H, W=W),
        out_shape=jax.ShapeDtypeStruct((NC, HW), x_nchw.dtype),
        # Single step, whole arrays resident in VMEM (working set < 100 KiB).
        in_specs=[
            pl.BlockSpec(memory_space=pltpu.MemorySpace.VMEM),
            pl.BlockSpec(memory_space=pltpu.MemorySpace.VMEM),
            pl.BlockSpec(memory_space=pltpu.MemorySpace.VMEM),
        ],
        out_specs=pl.BlockSpec(memory_space=pltpu.MemorySpace.VMEM),
        compiler_params=pltpu.CompilerParams(
            vmem_limit_bytes=32 * 1024 * 1024,
        ),
        cost_estimate=pl.CostEstimate(
            flops=flops,
            transcendentals=transcendentals,
            bytes_accessed=bytes_accessed,
        ),
    )(xf, w1m, w2m)

    return out.reshape(N, C, H, W)


# ---------------- pure-JAX reference (for correctness check only) -------------
def _reference(x_nchw, w1, b1, w2, b2):
    x = jnp.transpose(x_nchw, (0, 2, 3, 1)).astype(jnp.float32)  # NHWC
    N, H, W, C = x.shape

    def conv(a, w, b):
        ap = jnp.pad(a, ((0, 0), (1, 1), (1, 1), (0, 0)), mode="reflect")
        acc = jnp.broadcast_to(b, (N, H, W, C)).astype(jnp.float32)
        for dh in range(3):
            for dw in range(3):
                acc = acc + jnp.einsum(
                    "nhwi,io->nhwo", ap[:, dh:dh + H, dw:dw + W, :], w[dh, dw])
        return acc

    def inorm(a, eps=1e-5):
        mean = jnp.mean(a, axis=(1, 2), keepdims=True)
        var = jnp.mean((a - mean) ** 2, axis=(1, 2), keepdims=True)
        return (a - mean) / jnp.sqrt(var + eps)

    y = jnp.maximum(inorm(conv(x, w1, b1)), 0.0)
    y = inorm(conv(y, w2, b2))
    return jnp.transpose(x + y, (0, 3, 1, 2))


if __name__ == "__main__":
    # Small shapes consistent with the module: in_features = 4, 16x16 spatial.
    N, C, H, W = 2, 4, 16, 16
    key = jax.random.PRNGKey(0)
    kx, k1, k2, k3, k4 = jax.random.split(key, 5)

    x = jax.random.normal(kx, (N, C, H, W), dtype=jnp.float32)

    # Deterministic init mimicking PyTorch Conv2d's uniform(-b, b), b=1/sqrt(fan_in)
    fan_in = C * 3 * 3
    bound = 1.0 / math.sqrt(fan_in)
    w1 = jax.random.uniform(k1, (3, 3, C, C), jnp.float32, -bound, bound)
    b1 = jax.random.uniform(k2, (C,), jnp.float32, -bound, bound)
    w2 = jax.random.uniform(k3, (3, 3, C, C), jnp.float32, -bound, bound)
    b2 = jax.random.uniform(k4, (C,), jnp.float32, -bound, bound)

    out = jax.block_until_ready(residual_block(x, w1, b1, w2, b2))
    ref = jax.block_until_ready(_reference(x, w1, b1, w2, b2))

    assert out.shape == (N, C, H, W)
    # Reference includes the conv biases — this also validates that dropping
    # them in the kernel is an exact no-op under the following InstanceNorm.
    assert jnp.allclose(out, ref, rtol=1e-3, atol=1e-3), "mismatch vs reference"

    print("KERNEL_OK")
</pallas_src>

<mosaic_0001>
module attributes {stable_mosaic.version = 11 : i64} {
  func.func @_residual_block_kernel(%arg0: memref<8x256xf32, #tpu.memory_space<vmem>>, %arg1: memref<8x72xf32, #tpu.memory_space<vmem>>, %arg2: memref<8x72xf32, #tpu.memory_space<vmem>>, %arg3: memref<8x256xf32, #tpu.memory_space<vmem>>) attributes {dimension_semantics = [], scalar_prefetch = 0 : i64, scratch_operands = 0 : i64, tpu.core_type = #tpu.core_type<tc>} {
    %c0 = arith.constant 0 : index
    %c0_0 = arith.constant 0 : index
    %0 = vector.load %arg0[%c0, %c0_0] : memref<8x256xf32, #tpu.memory_space<vmem>>, vector<8x256xf32>
    %c0_1 = arith.constant 0 : index
    %c0_2 = arith.constant 0 : index
    %1 = vector.load %arg1[%c0_1, %c0_2] : memref<8x72xf32, #tpu.memory_space<vmem>>, vector<8x72xf32>
    %c0_3 = arith.constant 0 : index
    %c0_4 = arith.constant 0 : index
    %2 = vector.load %arg2[%c0_3, %c0_4] : memref<8x72xf32, #tpu.memory_space<vmem>>, vector<8x72xf32>
    %3 = tpu.iota {dimensions = array<i32: 1>} : vector<8x256xi32>
    %c16_i32 = arith.constant 16 : i32
    %c0_i32 = arith.constant 0 : i32
    %4 = arith.cmpi eq, %c16_i32, %c0_i32 : i32
    %c1_i32 = arith.constant 1 : i32
    %5 = arith.select %4, %c1_i32, %c16_i32 : i32
    %6 = vector.broadcast %5 : i32 to vector<8x256xi32>
    %7 = arith.remsi %3, %6 : vector<8x256xi32>
    %c0_i32_5 = arith.constant 0 : i32
    %8 = vector.broadcast %c0_i32_5 : i32 to vector<8x256xi32>
    %9 = arith.cmpi ne, %7, %8 : vector<8x256xi32>
    %c0_i32_6 = arith.constant 0 : i32
    %10 = vector.broadcast %c0_i32_6 : i32 to vector<8x256xi32>
    %11 = arith.cmpi slt, %7, %10 : vector<8x256xi32>
    %c0_i32_7 = arith.constant 0 : i32
    %12 = arith.cmpi slt, %5, %c0_i32_7 : i32
    %13 = vector.broadcast %12 : i1 to vector<8x256xi1>
    %14 = vector.broadcast %13 : vector<8x256xi1> to vector<8x256xi1>
    %15 = arith.xori %11, %14 : vector<8x256xi1>
    %16 = arith.andi %15, %9 : vector<8x256xi1>
    %17 = vector.broadcast %5 : i32 to vector<8x256xi32>
    %18 = arith.addi %7, %17 : vector<8x256xi32>
    %19 = arith.select %16, %18, %7 : vector<8x256xi1>, vector<8x256xi32>
    %c0_i32_8 = arith.constant 0 : i32
    %20 = vector.broadcast %c0_i32_8 : i32 to vector<8x256xi32>
    %21 = arith.cmpi eq, %19, %20 : vector<8x256xi32>
    %c15_i32 = arith.constant 15 : i32
    %22 = vector.broadcast %c15_i32 : i32 to vector<8x256xi32>
    %23 = arith.cmpi eq, %19, %22 : vector<8x256xi32>
    %c16_i32_9 = arith.constant 16 : i32
    %24 = vector.broadcast %c16_i32_9 : i32 to vector<8x256xi32>
    %25 = arith.cmpi slt, %3, %24 : vector<8x256xi32>
    %c240_i32 = arith.constant 240 : i32
    %26 = vector.broadcast %c240_i32 : i32 to vector<8x256xi32>
    %27 = arith.cmpi sge, %3, %26 : vector<8x256xi32>
    %c240_i32_10 = arith.constant 240 : i32
    %28 = tpu.dynamic_rotate %0 by %c240_i32_10 dim 1 : vector<8x256xf32>, i32 -> vector<8x256xf32>
    %c16_i32_11 = arith.constant 16 : i32
    %29 = tpu.dynamic_rotate %0 by %c16_i32_11 dim 1 : vector<8x256xf32>, i32 -> vector<8x256xf32>
    %30 = arith.select %25, %28, %29 : vector<8x256xi1>, vector<8x256xf32>
    %31 = arith.select %27, %29, %28 : vector<8x256xi1>, vector<8x256xf32>
    %c255_i32 = arith.constant 255 : i32
    %32 = tpu.dynamic_rotate %30 by %c255_i32 dim 1 : vector<8x256xf32>, i32 -> vector<8x256xf32>
    %c1_i32_12 = arith.constant 1 : i32
    %33 = tpu.dynamic_rotate %30 by %c1_i32_12 dim 1 : vector<8x256xf32>, i32 -> vector<8x256xf32>
    %34 = arith.select %21, %32, %33 : vector<8x256xi1>, vector<8x256xf32>
    %35 = arith.select %23, %33, %32 : vector<8x256xi1>, vector<8x256xf32>
    %c255_i32_13 = arith.constant 255 : i32
    %36 = tpu.dynamic_rotate %0 by %c255_i32_13 dim 1 : vector<8x256xf32>, i32 -> vector<8x256xf32>
    %c1_i32_14 = arith.constant 1 : i32
    %37 = tpu.dynamic_rotate %0 by %c1_i32_14 dim 1 : vector<8x256xf32>, i32 -> vector<8x256xf32>
    %38 = arith.select %21, %36, %37 : vector<8x256xi1>, vector<8x256xf32>
    %39 = arith.select %23, %37, %36 : vector<8x256xi1>, vector<8x256xf32>
    %c255_i32_15 = arith.constant 255 : i32
    %40 = tpu.dynamic_rotate %31 by %c255_i32_15 dim 1 : vector<8x256xf32>, i32 -> vector<8x256xf32>
    %c1_i32_16 = arith.constant 1 : i32
    %41 = tpu.dynamic_rotate %31 by %c1_i32_16 dim 1 : vector<8x256xf32>, i32 -> vector<8x256xf32>
    %42 = arith.select %21, %40, %41 : vector<8x256xi1>, vector<8x256xf32>
    %43 = arith.select %23, %41, %40 : vector<8x256xi1>, vector<8x256xf32>
    %44 = tpu.concatenate %34, %30, %35, %38, %0, %39, %42, %31, %43 in 0 : vector<8x256xf32>, vector<8x256xf32>, vector<8x256xf32>, vector<8x256xf32>, vector<8x256xf32>, vector<8x256xf32>, vector<8x256xf32>, vector<8x256xf32>, vector<8x256xf32> -> vector<72x256xf32>
    %cst = arith.constant dense<0.000000e+00> : vector<8x256xf32>
    %45 = tpu.matmul %1, %44, %cst {dimension_numbers = #tpu.dot_dimension_numbers<[1], [0], [0], [1], [0, 0, 1, 1], [], []>} : vector<8x72xf32>, vector<72x256xf32>, vector<8x256xf32> -> vector<8x256xf32>
    %cst_17 = arith.constant dense<0.000000e+00> : vector<8xf32>
    %46 = vector.multi_reduction <add>, %45, %cst_17 [1] : vector<8x256xf32> to vector<8xf32>
    %47 = vector.shape_cast %46 : vector<8xf32> to vector<8x1xf32>
    %cst_18 = arith.constant 2.560000e+02 : f32
    %48 = vector.broadcast %cst_18 : f32 to vector<8x1xf32>
    %49 = arith.divf %47, %48 : vector<8x1xf32>
    %50 = vector.broadcast %49 : vector<8x1xf32> to vector<8x256xf32>
    %51 = arith.subf %45, %50 : vector<8x256xf32>
    %52 = arith.mulf %51, %51 : vector<8x256xf32>
    %cst_19 = arith.constant dense<0.000000e+00> : vector<8xf32>
    %53 = vector.multi_reduction <add>, %52, %cst_19 [1] : vector<8x256xf32> to vector<8xf32>
    %54 = vector.shape_cast %53 : vector<8xf32> to vector<8x1xf32>
    %cst_20 = arith.constant 2.560000e+02 : f32
    %55 = vector.broadcast %cst_20 : f32 to vector<8x1xf32>
    %56 = arith.divf %54, %55 : vector<8x1xf32>
    %cst_21 = arith.constant 9.99999974E-6 : f32
    %57 = vector.broadcast %cst_21 : f32 to vector<8x1xf32>
    %58 = arith.addf %56, %57 : vector<8x1xf32>
    %59 = math.rsqrt %58 : vector<8x1xf32>
    %60 = vector.broadcast %59 : vector<8x1xf32> to vector<8x256xf32>
    %61 = arith.mulf %51, %60 : vector<8x256xf32>
    %cst_22 = arith.constant 0.000000e+00 : f32
    %62 = vector.broadcast %cst_22 : f32 to vector<8x256xf32>
    %63 = arith.maximumf %61, %62 : vector<8x256xf32>
    %c240_i32_23 = arith.constant 240 : i32
    %64 = tpu.dynamic_rotate %63 by %c240_i32_23 dim 1 : vector<8x256xf32>, i32 -> vector<8x256xf32>
    %c16_i32_24 = arith.constant 16 : i32
    %65 = tpu.dynamic_rotate %63 by %c16_i32_24 dim 1 : vector<8x256xf32>, i32 -> vector<8x256xf32>
    %66 = arith.select %25, %64, %65 : vector<8x256xi1>, vector<8x256xf32>
    %67 = arith.select %27, %65, %64 : vector<8x256xi1>, vector<8x256xf32>
    %c255_i32_25 = arith.constant 255 : i32
    %68 = tpu.dynamic_rotate %66 by %c255_i32_25 dim 1 : vector<8x256xf32>, i32 -> vector<8x256xf32>
    %c1_i32_26 = arith.constant 1 : i32
    %69 = tpu.dynamic_rotate %66 by %c1_i32_26 dim 1 : vector<8x256xf32>, i32 -> vector<8x256xf32>
    %70 = arith.select %21, %68, %69 : vector<8x256xi1>, vector<8x256xf32>
    %71 = arith.select %23, %69, %68 : vector<8x256xi1>, vector<8x256xf32>
    %c255_i32_27 = arith.constant 255 : i32
    %72 = tpu.dynamic_rotate %63 by %c255_i32_27 dim 1 : vector<8x256xf32>, i32 -> vector<8x256xf32>
    %c1_i32_28 = arith.constant 1 : i32
    %73 = tpu.dynamic_rotate %63 by %c1_i32_28 dim 1 : vector<8x256xf32>, i32 -> vector<8x256xf32>
    %74 = arith.select %21, %72, %73 : vector<8x256xi1>, vector<8x256xf32>
    %75 = arith.select %23, %73, %72 : vector<8x256xi1>, vector<8x256xf32>
    %c255_i32_29 = arith.constant 255 : i32
    %76 = tpu.dynamic_rotate %67 by %c255_i32_29 dim 1 : vector<8x256xf32>, i32 -> vector<8x256xf32>
    %c1_i32_30 = arith.constant 1 : i32
    %77 = tpu.dynamic_rotate %67 by %c1_i32_30 dim 1 : vector<8x256xf32>, i32 -> vector<8x256xf32>
    %78 = arith.select %21, %76, %77 : vector<8x256xi1>, vector<8x256xf32>
    %79 = arith.select %23, %77, %76 : vector<8x256xi1>, vector<8x256xf32>
    %80 = tpu.concatenate %70, %66, %71, %74, %63, %75, %78, %67, %79 in 0 : vector<8x256xf32>, vector<8x256xf32>, vector<8x256xf32>, vector<8x256xf32>, vector<8x256xf32>, vector<8x256xf32>, vector<8x256xf32>, vector<8x256xf32>, vector<8x256xf32> -> vector<72x256xf32>
    %cst_31 = arith.constant dense<0.000000e+00> : vector<8x256xf32>
    %81 = tpu.matmul %2, %80, %cst_31 {dimension_numbers = #tpu.dot_dimension_numbers<[1], [0], [0], [1], [0, 0, 1, 1], [], []>} : vector<8x72xf32>, vector<72x256xf32>, vector<8x256xf32> -> vector<8x256xf32>
    %cst_32 = arith.constant dense<0.000000e+00> : vector<8xf32>
    %82 = vector.multi_reduction <add>, %81, %cst_32 [1] : vector<8x256xf32> to vector<8xf32>
    %83 = vector.shape_cast %82 : vector<8xf32> to vector<8x1xf32>
    %cst_33 = arith.constant 2.560000e+02 : f32
    %84 = vector.broadcast %cst_33 : f32 to vector<8x1xf32>
    %85 = arith.divf %83, %84 : vector<8x1xf32>
    %86 = vector.broadcast %85 : vector<8x1xf32> to vector<8x256xf32>
    %87 = arith.subf %81, %86 : vector<8x256xf32>
    %88 = arith.mulf %87, %87 : vector<8x256xf32>
    %cst_34 = arith.constant dense<0.000000e+00> : vector<8xf32>
    %89 = vector.multi_reduction <add>, %88, %cst_34 [1] : vector<8x256xf32> to vector<8xf32>
    %90 = vector.shape_cast %89 : vector<8xf32> to vector<8x1xf32>
    %cst_35 = arith.constant 2.560000e+02 : f32
    %91 = vector.broadcast %cst_35 : f32 to vector<8x1xf32>
    %92 = arith.divf %90, %91 : vector<8x1xf32>
    %cst_36 = arith.constant 9.99999974E-6 : f32
    %93 = vector.broadcast %cst_36 : f32 to vector<8x1xf32>
    %94 = arith.addf %92, %93 : vector<8x1xf32>
    %95 = math.rsqrt %94 : vector<8x1xf32>
    %96 = vector.broadcast %95 : vector<8x1xf32> to vector<8x256xf32>
    %97 = arith.mulf %87, %96 : vector<8x256xf32>
    %98 = arith.addf %0, %97 : vector<8x256xf32>
    %c0_37 = arith.constant 0 : index
    %c0_38 = arith.constant 0 : index
    %99 = vector.load %arg3[%c0_37, %c0_38] : memref<8x256xf32, #tpu.memory_space<vmem>>, vector<8x256xf32>
    tpu.vector_store %arg3[%c0_37, %c0_38], %98 {strides = array<i32>} : memref<8x256xf32, #tpu.memory_space<vmem>>, vector<8x256xf32>,
    return
  }
}

</mosaic_0001>

<bundles_post_ra>
// kernel: residual_block.1
= control target key start
LH: loop header
LB: loop body
LE: loop exit
PB: predicated region body
PF: predicated region fallthrough
CT: control target
= control target key end

     0   :  { %s433_s16 = smov 112   ;;  %s434_s17 = smov 16   ;;  %v18_v3 = vlaneseq  ;;  %vm120_vm9 = vcmask 588800   ;;  %s680_s0 = inlined_call_operand.vmem [shape: f32[8,256], index: 0, kind: input, shape index: {}]   ;;  %s681_s1 = inlined_call_operand.vmem [shape: f32[8,72], index: 1, kind: input, shape index: {}]   ;;  %s682_s2 = inlined_call_operand.vmem [shape: f32[8,72], index: 2, kind: input, shape index: {}]   ;;  %s683_s3 = inlined_call_operand.vmem [shape: f32[8,256], index: 3, kind: output, shape index: {}]  }
   0x1   :  { %v461_v0 = vld [vmem:[%s680_s0] sm:$0xff]  ;;  %v466_v1 = vld [vmem:[%s680_s0 + $0x8] sm:$0xff]  ;;  %s435_s18 = smov 127   ;;  %s436_s0 = smov 1  }
   0x2   :  { %v347_v2 = vpack.i.bf16 %v466_v1, %v461_v0  ;;  %v473_v5 = vand.u32 127, %v18_v3 }
   0x4   :  { %348 = vrot.lane.b32.xlu0 %v347_v2, %s433_s16  ;;  %368 = vrot.lane.b32.xlu2 %v347_v2, %s435_s18  ;;  %v476_v6 = vadd.s32 128, %v473_v5  ;;  %vm49_vm0 = vcmp.lt.s32.totalorder %v473_v5, 16  ;;  %vm57_vm1 = vcmp.lt.s32.totalorder %v473_v5, 112  ;;  %v25_v24 = vand.u32 15, %v473_v5 }
   0x5   :  { %vm74_vm3 = vcmp.lt.s32.totalorder %v473_v5, 127  ;;  %vm81_vm5 = vcmp.lt.s32.totalorder %v473_v5, 1 }
   0x6   :  { %vm52_vm2 = vcmp.ge.s32.totalorder %v476_v6, 240  ;;  %v32_v22 = vand.u32 15, %v476_v6  ;;  %vm508_vm4 = vcmp.eq.s32.totalorder %v25_v24, 15  ;;  %vm529_vm7 = vcmp.eq.s32.totalorder %v25_v24, 0 }
   0x8   :  { %vm513_vm6 = vcmp.eq.s32.totalorder %v32_v22, 15  ;;  %vm535_vm8 = vcmp.eq.s32.totalorder %v32_v22, 0 }
   0xc   :  { %353 = vrot.lane.b32.xlu0 %v347_v2, %s434_s17  ;;  %373 = vrot.lane.b32.xlu2 %v347_v2, %s436_s0 }
  0x5e   :  { %v369_v20 = vpop.permute.xlu2 %368 }
  0x5f   :  { %v371_v27 = vunpack.i.h.bf16 %v369_v20  ;;  %v370_v29 = vunpack.i.l.bf16 %v369_v20 }
  0x61   :  { %v92_v43 = vsel %vm74_vm3, %v370_v29, %v371_v27  ;;  %v93_v46 = vsel %vm74_vm3, %v371_v27, %v370_v29 }
  0x66   :  { %v374_v23 = vpop.permute.xlu2 %373 }
  0x67   :  { %v376_v30 = vunpack.i.h.bf16 %v374_v23  ;;  %v375_v33 = vunpack.i.l.bf16 %v374_v23 }
  0x69   :  { %v99_v45 = vsel %vm81_vm5, %v376_v30, %v375_v33  ;;  %v98_v47 = vsel %vm81_vm5, %v375_v33, %v376_v30 }
  0x6a   :  { %v102_v54 = vsel %vm508_vm4, %v99_v45, %v92_v43  ;;  %v103_v55 = vsel %vm513_vm6, %v98_v47, %v93_v46  ;;  %v100_v60 = vsel %vm529_vm7, %v92_v43, %v99_v45  ;;  %v101_v61 = vsel %vm535_vm8, %v93_v46, %v98_v47 }
  0x76   :  { %v349_v4 = vpop.permute.xlu0 %348 }
  0x77   :  { %v351_v7 = vunpack.i.h.bf16 %v349_v4  ;;  %v350_v8 = vunpack.i.l.bf16 %v349_v4  ;;  %v16_v4 = vld [vmem:[%s681_s1] sm:$0xff] }
  0x79   :  { %v58_v14 = vsel %vm57_vm1, %v350_v8, %v351_v7  ;;  %v59_v15 = vsel %vm57_vm1, %v351_v7, %v350_v8 }
  0x7e   :  { %v354_v9 = vpop.permute.xlu0 %353 }
  0x7f   :  { %v356_v10 = vunpack.i.h.bf16 %v354_v9  ;;  %v355_v11 = vunpack.i.l.bf16 %v354_v9 }
  0x81   :  { %v484_v12 = vsel %vm49_vm0, %v355_v11, %v356_v10  ;;  %v65_v13 = vsel %vm49_vm0, %v356_v10, %v355_v11 }
  0x82   :  { %v69_v16 = vsel %vm52_vm2, %v484_v12, %v59_v15  ;;  %v497_v17 = vsel %vm49_vm0, %v58_v14, %v65_v13 }
  0x83   :  { %v357_v18 = vpack.i.bf16 %v69_v16, %v58_v14  ;;  %v377_v19 = vpack.i.bf16 %v484_v12, %v497_v17 }
  0x85   :  { %358 = vrot.lane.b32.xlu1 %v357_v18, %s435_s18  ;;  %378 = vrot.lane.b32.xlu0 %v377_v19, %s435_s18 }
  0x8d   :  { %363 = vrot.lane.b32.xlu1 %v357_v18, %s436_s0 }
  0x95   :  { %383 = vrot.lane.b32.xlu1 %v377_v19, %s436_s0 }
  0xf7   :  { %v359_v21 = vpop.permute.xlu1 %358  ;;  %v379_v48 = vpop.permute.xlu0 %378 }
  0xf8   :  { %v361_v25 = vunpack.i.h.bf16 %v359_v21  ;;  %v360_v26 = vunpack.i.l.bf16 %v359_v21  ;;  %v381_v56 = vunpack.i.h.bf16 %v379_v48  ;;  %v380_v57 = vunpack.i.l.bf16 %v379_v48 }
  0xfa   :  { %v108_v36 = vsel %vm74_vm3, %v360_v26, %v361_v25  ;;  %v109_v38 = vsel %vm74_vm3, %v361_v25, %v360_v26  ;;  %v75_v62 = vsel %vm74_vm3, %v380_v57, %v381_v56  ;;  %v76_v63 = vsel %vm74_vm3, %v381_v56, %v380_v57 }
  0xff   :  { %v364_v28 = vpop.permute.xlu1 %363 }
 0x100   :  { %v366_v31 = vunpack.i.h.bf16 %v364_v28  ;;  %v365_v32 = vunpack.i.l.bf16 %v364_v28 }
 0x102   :  { %v115_v37 = vsel %vm81_vm5, %v366_v31, %v365_v32  ;;  %v114_v39 = vsel %vm81_vm5, %v365_v32, %v366_v31 }
 0x103   :  { %v118_v40 = vsel %vm508_vm4, %v115_v37, %v108_v36  ;;  %v119_v41 = vsel %vm513_vm6, %v114_v39, %v109_v38  ;;  %v116_v50 = vsel %vm529_vm7, %v108_v36, %v115_v37  ;;  %v117_v51 = vsel %vm535_vm8, %v109_v38, %v114_v39 }
 0x104   :  { %131 = vmatpush.msra.mxu0 %v118_v40  ;;  %151 = vmatpush.msra.mxu1 %v119_v41 }
 0x106   :  { %132 = vmatpush.msra.mxu0 %v58_v14  ;;  %152 = vmatpush.msra.mxu1 %v69_v16 }
 0x107   :  { %v384_v49 = vpop.permute.xlu1 %383 }
 0x108   :  { %v386_v52 = vunpack.i.h.bf16 %v384_v49  ;;  %v385_v53 = vunpack.i.l.bf16 %v384_v49  ;;  %133 = vmatpush.msra.mxu0 %v116_v50  ;;  %153 = vmatpush.msra.mxu1 %v117_v51 }
 0x10a   :  { %134 = vmatpush.msra.mxu0 %v102_v54  ;;  %154 = vmatpush.msra.mxu1 %v103_v55  ;;  %v83_v58 = vsel %vm81_vm5, %v386_v52, %v385_v53  ;;  %v82_v59 = vsel %vm81_vm5, %v385_v53, %v386_v52 }
 0x10b   :  { %v86_v2 = vsel %vm508_vm4, %v83_v58, %v75_v62  ;;  %v87_v3 = vsel %vm513_vm6, %v82_v59, %v76_v63  ;;  %v84_v7 = vsel %vm529_vm7, %v75_v62, %v83_v58  ;;  %v85_v8 = vsel %vm535_vm8, %v76_v63, %v82_v59 }
 0x10c   :  { %135 = vmatpush.msra.mxu0 %v461_v0  ;;  %155 = vmatpush.msra.mxu1 %v466_v1 }
 0x10e   :  { %136 = vmatpush.msra.mxu0 %v100_v60  ;;  %156 = vmatpush.msra.mxu1 %v101_v61 }
 0x110   :  { %137 = vmatpush.msra.mxu0 %v86_v2  ;;  %157 = vmatpush.msra.mxu1 %v87_v3 }
 0x112   :  { %138 = vmatpush.msra.mxu0 %v497_v17  ;;  %158 = vmatpush.msra.mxu1 %v484_v12  ;;  %v437_v12 = vmov 256.0  }
 0x113   :  { %427 = vrcp.f32 %v437_v12 }
 0x114   :  { %139 = vmatpush.msra.mxu0 %v84_v7  ;;  %159 = vmatpush.msra.mxu1 %v85_v8 }
 0x115   :  { %338 = vmatmul.msk.f32.vlgmr.msra.gmra.mxu0 %vm120_vm9, %v16_v4  ;;  %339 = vmatmul.msk.f32.vlgmr.msra.gmra.mxu1 %vm120_vm9, %v16_v4 }
 0x119   :  { %v428_v13 = vpop.eup %427 }
 0x11a   :  { %v168_v14 = vmul.f32 256.0, %v428_v13  ;;  %vm172_vm10 = vweird.f32 %v428_v13 }
 0x11c   :  { %v169_v15 = vsub.f32 1.0, %v168_v14 }
 0x11e   :  { %v170_v16 = vmul.f32 %v428_v13, %v169_v15 }
 0x120   :  { %v171_v17 = vadd.f32 %v428_v13, %v170_v16 }
 0x122   :  { %v582_v18 = vsel %vm172_vm10, %v428_v13, %v171_v17 }
 0x192   :  { %v141_v9 = vpop.f32.mrf.mxu0  ;;  %v161_v10 = vpop.f32.mrf.mxu1 }
 0x193   :  { %v164_v11 = vadd.f32 %v161_v10, %v141_v9 }
 0x195   :  { %165 = vadd.xlane.f32.xlu2 %v164_v11 }
 0x208   :  { %v166_v19 = vpop.xlane.xlu2 %165 }
 0x209   :  { %v174_v20 = vmul.f32 %v582_v18, %v166_v19 }
 0x20b   :  { %v175_v21 = vsub.f32 %v141_v9, %v174_v20  ;;  %v176_v22 = vsub.f32 %v161_v10, %v174_v20 }
 0x20d   :  { %v177_v23 = vmul.f32 %v175_v21, %v175_v21  ;;  %v178_v24 = vmul.f32 %v176_v22, %v176_v22 }
 0x20f   :  { %v179_v25 = vadd.f32 %v178_v24, %v177_v23 }
 0x211   :  { %180 = vadd.xlane.f32.xlu0 %v179_v25 }
 0x284   :  { %v181_v26 = vpop.xlane.xlu0 %180 }
 0x285   :  { %v182_v27 = vmul.f32 %v181_v26, %v582_v18 }
 0x287   :  { %v183_v28 = vadd.f32 1e-05, %v182_v27 }
 0x289   :  { %429 = vrsqrt.f32 %v183_v28  ;;  %vm190_vm12 = vweird.f32 %v183_v28 }
 0x28f   :  { %v430_v29 = vpop.eup %429 }
 0x290   :  { %v185_v30 = vmul.f32 %v430_v29, %v183_v28  ;;  %vm191_vm11 = vweird.f32 %v430_v29 }
 0x291   :  { %vm192_vm13 = vmor %vm190_vm12, %vm191_vm11 }
 0x292   :  { %v186_v31 = vmul.f32 %v430_v29, %v185_v30 }
 0x294   :  { %v187_v32 = vmul.f32 0.5, %v186_v31 }
 0x296   :  { %v188_v33 = vsub.f32 1.5, %v187_v32 }
 0x298   :  { %v189_v36 = vmul.f32 %v430_v29, %v188_v33 }
 0x29a   :  { %v193_v37 = vsel %vm192_vm13, %v430_v29, %v189_v36 }
 0x29b   :  { %v586_v38 = vmul.f32 %v193_v37, %v175_v21  ;;  %v588_v39 = vmul.f32 %v193_v37, %v176_v22 }
 0x29d   :  { %v196_v40 = vmax.f32 %v586_v38, 0.0  ;;  %v197_v41 = vmax.f32 %v588_v39, 0.0 }
 0x29f   :  { %v412_v43 = vpack.i.bf16 %v197_v41, %v196_v40 }
 0x2a1   :  { %413 = vrot.lane.b32.xlu2 %v412_v43, %s436_s0  ;;  %388 = vrot.lane.b32.xlu1 %v412_v43, %s433_s16 }
 0x2a9   :  { %393 = vrot.lane.b32.xlu1 %v412_v43, %s434_s17 }
 0x2fb   :  { %v414_v8 = vpop.permute.xlu2 %413 }
 0x2fc   :  { %v416_v11 = vunpack.i.h.bf16 %v414_v8  ;;  %v415_v12 = vunpack.i.l.bf16 %v414_v8 }
 0x2fe   :  { %v241_v20 = vsel %vm81_vm5, %v416_v11, %v415_v12  ;;  %v240_v22 = vsel %vm81_vm5, %v415_v12, %v416_v11 }
 0x313   :  { %v389_v45 = vpop.permute.xlu1 %388 }
 0x314   :  { %v391_v46 = vunpack.i.h.bf16 %v389_v45  ;;  %v390_v47 = vunpack.i.l.bf16 %v389_v45 }
 0x316   :  { %v202_v51 = vsel %vm57_vm1, %v390_v47, %v391_v46  ;;  %v203_v52 = vsel %vm57_vm1, %v391_v46, %v390_v47 }
 0x31b   :  { %v394_v48 = vpop.permute.xlu1 %393 }
 0x31c   :  { %v396_v49 = vunpack.i.h.bf16 %v394_v48  ;;  %v395_v50 = vunpack.i.l.bf16 %v394_v48 }
 0x31e   :  { %v601_v53 = vsel %vm49_vm0, %v395_v50, %v396_v49  ;;  %v209_v54 = vsel %vm49_vm0, %v396_v49, %v395_v50 }
 0x31f   :  { %v213_v55 = vsel %vm52_vm2, %v601_v53, %v203_v52  ;;  %v210_v56 = vsel %vm49_vm0, %v202_v51, %v209_v54 }
 0x320   :  { %v397_v57 = vpack.i.bf16 %v213_v55, %v202_v51  ;;  %v422_v58 = vpack.i.bf16 %v601_v53, %v210_v56 }
 0x322   :  { %398 = vrot.lane.b32.xlu1 %v397_v57, %s435_s18  ;;  %423 = vrot.lane.b32.xlu0 %v422_v58, %s436_s0 }
 0x32a   :  { %403 = vrot.lane.b32.xlu1 %v397_v57, %s436_s0 }
 0x332   :  { %408 = vrot.lane.b32.xlu1 %v412_v43, %s435_s18 }
 0x33a   :  { %418 = vrot.lane.b32.xlu1 %v422_v58, %s435_s18 }
 0x394   :  { %v399_v59 = vpop.permute.xlu1 %398  ;;  %v424_v23 = vpop.permute.xlu0 %423 }
 0x395   :  { %v401_v60 = vunpack.i.h.bf16 %v399_v59  ;;  %v400_v6 = vunpack.i.l.bf16 %v399_v59  ;;  %v426_v26 = vunpack.i.h.bf16 %v424_v23  ;;  %v425_v27 = vunpack.i.l.bf16 %v424_v23 }
 0x397   :  { %v250_v2 = vsel %vm74_vm3, %v400_v6, %v401_v60  ;;  %v251_v4 = vsel %vm74_vm3, %v401_v60, %v400_v6  ;;  %v225_v36 = vsel %vm81_vm5, %v426_v26, %v425_v27  ;;  %v224_v38 = vsel %vm81_vm5, %v425_v27, %v426_v26 }
 0x39c   :  { %v404_v61 = vpop.permute.xlu1 %403 }
 0x39d   :  { %v406_v62 = vunpack.i.h.bf16 %v404_v61  ;;  %v405_v63 = vunpack.i.l.bf16 %v404_v61 }
 0x39f   :  { %v257_v3 = vsel %vm81_vm5, %v406_v62, %v405_v63  ;;  %v256_v7 = vsel %vm81_vm5, %v405_v63, %v406_v62 }
 0x3a0   :  { %v260_v9 = vsel %vm508_vm4, %v257_v3, %v250_v2  ;;  %v261_v10 = vsel %vm513_vm6, %v256_v7, %v251_v4  ;;  %v258_v14 = vsel %vm529_vm7, %v250_v2, %v257_v3  ;;  %v259_v15 = vsel %vm535_vm8, %v251_v4, %v256_v7 }
 0x3a1   :  { %272 = vmatpush.msra.mxu2 %v260_v9  ;;  %292 = vmatpush.msra.mxu3 %v261_v10 }
 0x3a3   :  { %273 = vmatpush.msra.mxu2 %v202_v51  ;;  %293 = vmatpush.msra.mxu3 %v213_v55 }
 0x3a4   :  { %v409_v13 = vpop.permute.xlu1 %408 }
 0x3a5   :  { %v411_v16 = vunpack.i.h.bf16 %v409_v13  ;;  %v410_v17 = vunpack.i.l.bf16 %v409_v13  ;;  %274 = vmatpush.msra.mxu2 %v258_v14  ;;  %294 = vmatpush.msra.mxu3 %v259_v15 }
 0x3a7   :  { %v234_v19 = vsel %vm74_vm3, %v410_v17, %v411_v16  ;;  %v235_v21 = vsel %vm74_vm3, %v411_v16, %v410_v17 }
 0x3a8   :  { %v244_v24 = vsel %vm508_vm4, %v241_v20, %v234_v19  ;;  %v245_v25 = vsel %vm513_vm6, %v240_v22, %v235_v21  ;;  %v242_v29 = vsel %vm529_vm7, %v234_v19, %v241_v20  ;;  %v243_v30 = vsel %vm535_vm8, %v235_v21, %v240_v22 }
 0x3a9   :  { %275 = vmatpush.msra.mxu2 %v244_v24  ;;  %295 = vmatpush.msra.mxu3 %v245_v25 }
 0x3ab   :  { %276 = vmatpush.msra.mxu2 %v196_v40  ;;  %296 = vmatpush.msra.mxu3 %v197_v41  ;;  %v17_v41 = vld [vmem:[%s682_s2] sm:$0xff] }
 0x3ac   :  { %v419_v28 = vpop.permute.xlu1 %418 }
 0x3ad   :  { %v421_v31 = vunpack.i.h.bf16 %v419_v28  ;;  %v420_v32 = vunpack.i.l.bf16 %v419_v28  ;;  %277 = vmatpush.msra.mxu2 %v242_v29  ;;  %297 = vmatpush.msra.mxu3 %v243_v30 }
 0x3af   :  { %v218_v33 = vsel %vm74_vm3, %v420_v32, %v421_v31  ;;  %v219_v37 = vsel %vm74_vm3, %v421_v31, %v420_v32 }
 0x3b0   :  { %v228_v39 = vsel %vm508_vm4, %v225_v36, %v218_v33  ;;  %v229_v40 = vsel %vm513_vm6, %v224_v38, %v219_v37  ;;  %v226_v43 = vsel %vm529_vm7, %v218_v33, %v225_v36  ;;  %v227_v5 = vsel %vm535_vm8, %v219_v37, %v224_v38 }
 0x3b1   :  { %278 = vmatpush.msra.mxu2 %v228_v39  ;;  %298 = vmatpush.msra.mxu3 %v229_v40 }
 0x3b3   :  { %279 = vmatpush.msra.mxu2 %v210_v56  ;;  %299 = vmatpush.msra.mxu3 %v601_v53 }
 0x3b5   :  { %280 = vmatpush.msra.mxu2 %v226_v43  ;;  %300 = vmatpush.msra.mxu3 %v227_v5 }
 0x3b6   :  { %340 = vmatmul.msk.f32.vlgmr.msra.gmra.mxu2 %vm120_vm9, %v17_v41  ;;  %341 = vmatmul.msk.f32.vlgmr.msra.gmra.mxu3 %vm120_vm9, %v17_v41 }
 0x439   :  { %v282_v34 = vpop.f32.mrf.mxu2  ;;  %v302_v35 = vpop.f32.mrf.mxu3 }
 0x43a   :  { %v305_v45 = vadd.f32 %v302_v35, %v282_v34 }
 0x43c   :  { %306 = vadd.xlane.f32.xlu1 %v305_v45 }
 0x4af   :  { %v307_v46 = vpop.xlane.xlu1 %306 }
 0x4b0   :  { %v308_v47 = vmul.f32 %v307_v46, %v582_v18 }
 0x4b2   :  { %v309_v48 = vsub.f32 %v282_v34, %v308_v47  ;;  %v310_v49 = vsub.f32 %v302_v35, %v308_v47 }
 0x4b4   :  { %v311_v42 = vmul.f32 %v309_v48, %v309_v48  ;;  %v312_v50 = vmul.f32 %v310_v49, %v310_v49 }
 0x4b6   :  { %v313_v51 = vadd.f32 %v312_v50, %v311_v42 }
 0x4b8   :  { %314 = vadd.xlane.f32.xlu2 %v313_v51 }
 0x52b   :  { %v315_v44 = vpop.xlane.xlu2 %314 }
 0x52c   :  { %v316_v52 = vmul.f32 %v315_v44, %v582_v18 }
 0x52e   :  { %v317_v53 = vadd.f32 1e-05, %v316_v52 }
 0x530   :  { %431 = vrsqrt.f32 %v317_v53  ;;  %vm324_vm15 = vweird.f32 %v317_v53 }
 0x536   :  { %v432_v54 = vpop.eup %431 }
 0x537   :  { %v319_v55 = vmul.f32 %v432_v54, %v317_v53  ;;  %vm325_vm14 = vweird.f32 %v432_v54 }
 0x538   :  { %vm326_vm0 = vmor %vm324_vm15, %vm325_vm14 }
 0x539   :  { %v320_v56 = vmul.f32 %v432_v54, %v319_v55 }
 0x53b   :  { %v321_v57 = vmul.f32 0.5, %v320_v56 }
 0x53d   :  { %v322_v58 = vsub.f32 1.5, %v321_v57 }
 0x53f   :  { %v323_v59 = vmul.f32 %v432_v54, %v322_v58 }
 0x541   :  { %v327_v60 = vsel %vm326_vm0, %v432_v54, %v323_v59 }
 0x542   :  { %v328_v6 = vmul.f32 %v327_v60, %v309_v48  ;;  %v329_v61 = vmul.f32 %v327_v60, %v310_v49 }
 0x544   :  { %v330_v62 = vadd.f32 %v328_v6, %v461_v0  ;;  %v331_v63 = vadd.f32 %v329_v61, %v466_v1 }
 0x546   :  { %332 = vst [vmem:[%s683_s3] sm:$0xff] %v330_v62 }
 0x547   :  { %333 = vst [vmem:[%s683_s3 + $0x8] sm:$0xff] %v331_v63 }

</bundles_post_ra>
